<compile_context>
chip_gen: v7x
topology: tpu7x:2x2x1
jax: 0.10.0
libtpu: 0.0.40
codegen_flags: <defaults>
</compile_context>

<pallas_src>
import functools
import math

import jax
import jax.numpy as jnp
from jax.experimental import pallas as pl
from jax.experimental.pallas import tpu as pltpu

_EPS = 1e-5
_MIB = 1024 * 1024


# ---------------------------------------------------------------------------
# Hardware / tiling helpers
# ---------------------------------------------------------------------------
def _vmem_capacity_bytes():
    """Per-core VMEM capacity (64 MiB on v7x, 128 MiB on v5e/v6e)."""
    try:
        return max(32 * _MIB, int(pltpu.get_tpu_info().vmem_capacity_bytes))
    except Exception:
        pass
    # Do NOT silently halve the budget on 128 MiB parts: only assume 64 MiB
    # when the device is known to be v7x.
    try:
        kind = jax.devices()[0].device_kind.lower()
        if "v7" in kind:
            return 64 * _MIB
    except Exception:
        pass
    return 128 * _MIB


def _round_down_mult(x, m):
    return (x // m) * m


def _round_up_mult(x, m):
    return -(-x // m) * m


def _sublane_granularity(itemsize):
    # Packed-dtype native sublane tile: 8 rows (f32), 16 (bf16), 32 (int8/fp8).
    return max(8, 32 // max(1, itemsize))


def _even_grid_steps(G, tg, gran):
    """Nudge the G tile slightly down so the number of grid steps is even,
    letting the 'parallel' axis shard evenly across v7x's two TensorCores.
    Never shrinks below ~half the tile (keeps v5e/v6e DMAs large)."""
    steps = -(-G // tg)
    if steps <= 1 or steps % 2 == 0:
        return tg
    floor_tg = max(gran, _round_down_mult(tg // 2, gran))
    t = tg - gran
    while t >= floor_tg:
        if (-(-G // t)) % 2 == 0:
            return t
        t -= gran
    return tg


def _split_single_block(G, gran, block_bytes):
    """A one-step grid cannot pipeline (load/compute/store serialize) and only
    uses one TensorCore on v7x; split big single blocks into two steps."""
    if G >= 2 * gran and block_bytes > 2 * _MIB:
        tg = _round_up_mult(-(-G // 2), gran)
        if tg < G:
            return tg
    return G


def _choose_tile_g(S, G, K, budget_bytes, itemsize):
    """Largest G tile whose working set fits the budget (dtype-aware):
    2x double-buffered input + 2x output at native dtype + ~8 B/elem for the
    in-kernel f32 copy / centered temp.  None => one group does not fit
    => two-pass fallback."""
    gran = _sublane_granularity(itemsize)
    bytes_per_group = S * K * (4 * itemsize + 8)
    max_tg = budget_bytes // bytes_per_group
    if max_tg >= G:
        return _split_single_block(G, gran, G * bytes_per_group)
    if max_tg < gran:
        return None
    tg = _round_down_mult(min(max_tg, G), gran)
    return _even_grid_steps(G, tg, gran)


def _sum_sk(v):
    """(S, TG, K) -> (1, TG, 1).  Reduce the S axis first (cheap VPU vreg adds),
    then the lane (K) axis, cutting XLU cross-lane reductions by a factor of S."""
    if v.shape[0] > 1:
        v = jnp.sum(v, axis=0, keepdims=True)
    return jnp.sum(v, axis=2, keepdims=True)


# ---------------------------------------------------------------------------
# Main path (K >= 128): single-pass fused stats + normalize, tiled over G.
# ---------------------------------------------------------------------------
def _norm_body(x_ref, o_ref, gamma, beta, eps):
    x = x_ref[...].astype(jnp.float32)            # (S, TG, K)
    n = float(x.shape[0] * x.shape[2])
    mean = _sum_sk(x) / n                         # (1, TG, 1)
    # Mean-then-center is kept deliberately (no E[x^2]-mean^2 cancellation);
    # the f32 temp is already accounted for in the VMEM budget (8 B/elem).
    cent = x - mean
    var = _sum_sk(cent * cent) / n                # biased variance (PyTorch)
    inv = jax.lax.rsqrt(var + eps)
    # Note: a ragged final G tile computes rsqrt on out-of-range padding rows;
    # those outputs are discarded by Pallas, so any Inf/NaN there is harmless.
    if gamma is None:
        scale, shift = inv, -mean * inv
    else:
        scale = inv * gamma
        shift = beta - mean * scale
    # Affine folded into (scale, shift): one mul + one add per wide element.
    o_ref[...] = (x * scale + shift).astype(o_ref.dtype)


def _norm_affine_kernel(x_ref, gamma_ref, beta_ref, o_ref, *, eps):
    _norm_body(x_ref, o_ref, gamma_ref[...], beta_ref[...], eps)


def _norm_plain_kernel(x_ref, o_ref, *, eps):
    _norm_body(x_ref, o_ref, None, None, eps)


# ---------------------------------------------------------------------------
# Lane-dense path (K < 128): x viewed as (S, G*K); per-group reductions and
# broadcasts via small one-hot "group map" matmuls on the idle MXU, so HBM
# loads/stores are unmasked full-lane transfers.
# ---------------------------------------------------------------------------
def _ld_body(x_ref, m_ref, mt_ref, o_ref, gamma_l, beta_l, eps, n_groups, k_per_group):
    x = x_ref[...].astype(jnp.float32)            # (S, TG*K), lane-dense
    s, _ = x.shape
    tg = m_ref.shape[1]
    if n_groups % tg != 0:
        # Ragged last block: zero out-of-range lanes so padding garbage
        # (possibly NaN) cannot leak into valid groups through the matmuls.
        valid = (n_groups - pl.program_id(0) * tg) * k_per_group
        lane = jax.lax.broadcasted_iota(jnp.int32, x.shape, 1)
        xm = jnp.where(lane < valid, x, 0.0)
    else:
        xm = x
    n = float(s * k_per_group)
    grp = m_ref[...]                              # (TG*K, TG) one-hot group map
    grp_t = mt_ref[...]                           # (TG, TG*K)
    xs = xm if s == 1 else jnp.sum(xm, axis=0, keepdims=True)          # (1, TG*K)
    mean_g = jnp.dot(xs, grp, preferred_element_type=jnp.float32) / n  # (1, TG)
    mean_l = jnp.dot(mean_g, grp_t, preferred_element_type=jnp.float32)
    cent = xm - mean_l
    c2 = cent * cent
    cs = c2 if s == 1 else jnp.sum(c2, axis=0, keepdims=True)
    var_g = jnp.dot(cs, grp, preferred_element_type=jnp.float32) / n   # (1, TG)
    inv_l = jnp.dot(jax.lax.rsqrt(var_g + eps), grp_t,
                    preferred_element_type=jnp.float32)                # (1, TG*K)
    if gamma_l is None:
        scale, shift = inv_l, -mean_l * inv_l
    else:
        scale = inv_l * gamma_l
        shift = beta_l - mean_l * scale
    o_ref[...] = (x * scale + shift).astype(o_ref.dtype)


def _ld_affine_kernel(x_ref, m_ref, mt_ref, gamma_ref, beta_ref, o_ref,
                      *, eps, n_groups, k_per_group):
    _ld_body(x_ref, m_ref, mt_ref, o_ref, gamma_ref[...], beta_ref[...],
             eps, n_groups, k_per_group)


def _ld_plain_kernel(x_ref, m_ref, mt_ref, o_ref, *, eps, n_groups, k_per_group):
    _ld_body(x_ref, m_ref, mt_ref, o_ref, None, None, eps, n_groups, k_per_group)


def _choose_tile_g_lanedense(S, G, K, budget_bytes, itemsize, affine):
    gran = _sublane_granularity(itemsize)
    g0 = 128 // math.gcd(K, 128)                  # ensures (tg*K) % 128 == 0
    g0 = g0 * gran // math.gcd(g0, gran)          # lcm with packed-sublane gran
    per_g = S * K * (4 * itemsize + 8) + (16 * K if affine else 0)
    quad = 16 * K                                 # group-map matrices (M + Mt)
    disc = float(per_g) * per_g + 4.0 * quad * budget_bytes
    tg_max = int((math.sqrt(disc) - per_g) / (2 * quad))
    tg_max = min(tg_max, 512)                     # keep the MXU segment-reduce cheap
    if tg_max >= G:
        return _split_single_block(G, g0, G * per_g)
    tg = _round_down_mult(tg_max, g0)
    if tg < g0:
        return None
    return _even_grid_steps(G, tg, g0)


def _lane_dense_norm(x3, gamma, beta, *, eps, budget, vmem_limit):
    S, G, K = x3.shape
    affine = gamma is not None
    ib = x3.dtype.itemsize
    tg = _choose_tile_g_lanedense(S, G, K, budget, ib, affine)
    if tg is None:
        return None
    tgk = tg * K
    x2 = x3.reshape(S, G * K)                     # free reshape
    steps = pl.cdiv(G, tg)
    # One-hot group-membership matrices, built once in the wrapper; constant
    # index maps keep them resident in VMEM across grid steps.
    lane = jnp.arange(tgk, dtype=jnp.int32)[:, None]
    grp = jnp.arange(tg, dtype=jnp.int32)[None, :]
    gmap = ((lane // K) == grp).astype(jnp.float32)       # (tgk, tg)
    gmap_t = jnp.transpose(gmap)                          # (tg, tgk)

    x_spec = pl.BlockSpec((S, tgk), lambda g: (0, g))
    m_spec = pl.BlockSpec((tgk, tg), lambda g: (0, 0))
    mt_spec = pl.BlockSpec((tg, tgk), lambda g: (0, 0))
    params = pltpu.CompilerParams(dimension_semantics=("parallel",),
                                  vmem_limit_bytes=vmem_limit)
    kw = dict(eps=eps, n_groups=G, k_per_group=K)
    if affine:
        # Pre-expanded lane-dense gamma/beta (extra HBM read ~= 1/S of x traffic)
        # avoids any in-kernel sublane->lane relayout of the parameters.
        g1 = jnp.asarray(gamma, jnp.float32).reshape(G)
        b1 = jnp.asarray(beta, jnp.float32).reshape(G)
        gamma_l = jnp.repeat(g1, K).reshape(1, G * K)
        beta_l = jnp.repeat(b1, K).reshape(1, G * K)
        p_spec = pl.BlockSpec((1, tgk), lambda g: (0, g))
        y2 = pl.pallas_call(
            functools.partial(_ld_affine_kernel, **kw),
            out_shape=jax.ShapeDtypeStruct((S, G * K), x3.dtype),
            grid=(steps,),
            in_specs=[x_spec, m_spec, mt_spec, p_spec, p_spec],
            out_specs=x_spec,
            compiler_params=params,
        )(x2, gmap, gmap_t, gamma_l, beta_l)
    else:
        y2 = pl.pallas_call(
            functools.partial(_ld_plain_kernel, **kw),
            out_shape=jax.ShapeDtypeStruct((S, G * K), x3.dtype),
            grid=(steps,),
            in_specs=[x_spec, m_spec, mt_spec],
            out_specs=x_spec,
            compiler_params=params,
        )(x2, gmap, gmap_t)
    return y2.reshape(S, G, K)


# ---------------------------------------------------------------------------
# Fallback path: two-pass (stats accumulation over K tiles, then apply).
# ---------------------------------------------------------------------------
def _block_partial_stats(x, k_total):
    """Per-group (mean, M2, count) of this K tile; masks the ragged last tile."""
    s, _, tk = x.shape
    if k_total % tk == 0:
        n_b = jnp.float32(s * tk)
        mean_b = _sum_sk(x) / n_b
        cent = x - mean_b
        m2_b = _sum_sk(cent * cent)
    else:
        rem = k_total - pl.program_id(1) * tk          # valid lanes in this tile
        lane = jax.lax.broadcasted_iota(jnp.int32, x.shape, 2)
        mask = lane < rem
        n_b = jnp.minimum(jnp.int32(tk), rem).astype(jnp.float32) * float(s)
        mean_b = _sum_sk(jnp.where(mask, x, 0.0)) / n_b
        cent = jnp.where(mask, x - mean_b, 0.0)
        m2_b = _sum_sk(cent * cent)
    return mean_b, m2_b, n_b


def _stats_body(x_ref, scale_ref, shift_ref, mean_sc, m2_sc, gamma, beta, eps, k_total):
    k = pl.program_id(1)
    x = x_ref[...].astype(jnp.float32)               # (S, TG, TK)
    s, _, tk = x.shape
    mean_b, m2_b, n_b = _block_partial_stats(x, k_total)

    @pl.when(k == 0)
    def _():
        mean_sc[...] = jnp.zeros_like(mean_sc)
        m2_sc[...] = jnp.zeros_like(m2_sc)

    # Chan's parallel-variance combine: (running stats) + (this tile).
    # NOTE: assumes all previous K tiles were full (ragged tile is last) and the
    # K axis runs sequentially -- keep it "arbitrary", never "parallel"/reordered.
    n_a = k.astype(jnp.float32) * float(s * tk)
    mean_a = mean_sc[...]
    m2_a = m2_sc[...]
    n_ab = n_a + n_b
    delta = mean_b - mean_a
    mean_sc[...] = mean_a + delta * (n_b / n_ab)
    m2_sc[...] = m2_a + m2_b + (delta * delta) * (n_a * n_b / n_ab)

    @pl.when(k == pl.num_programs(1) - 1)
    def _():
        n_tot = float(s) * float(k_total)
        inv = jax.lax.rsqrt(m2_sc[...] / n_tot + eps)
        mean = mean_sc[...]
        if gamma is None:
            scale, shift = inv, -mean * inv
        else:
            scale = inv * gamma
            shift = beta - mean * scale
        scale_ref[...] = scale
        shift_ref[...] = shift


def _stats_affine_kernel(gamma_ref, beta_ref, x_ref, scale_ref, shift_ref,
                         mean_sc, m2_sc, *, eps, k_total):
    _stats_body(x_ref, scale_ref, shift_ref, mean_sc, m2_sc,
                gamma_ref[...], beta_ref[...], eps, k_total)


def _stats_plain_kernel(x_ref, scale_ref, shift_ref, mean_sc, m2_sc, *, eps, k_total):
    _stats_body(x_ref, scale_ref, shift_ref, mean_sc, m2_sc, None, None, eps, k_total)


def _apply_kernel(scale_ref, shift_ref, x_ref, o_ref):
    x = x_ref[...].astype(jnp.float32)
    o_ref[...] = (x * scale_ref[...] + shift_ref[...]).astype(o_ref.dtype)


# ---------------------------------------------------------------------------
# Wrapper
# ---------------------------------------------------------------------------
def _group_norm(x3, gamma, beta, *, eps=_EPS, vmem_budget=None):
    """Normalize x3 of shape (S, G, K) per group g over axes (S, K); optional affine."""
    S, G, K = x3.shape
    cap = _vmem_capacity_bytes()
    budget = int(vmem_budget) if vmem_budget is not None else cap // 2
    vmem_limit = (cap // 4) * 3                     # Mosaic scoped-VMEM headroom
    ib = x3.dtype.itemsize
    affine = gamma is not None

    # Small-K shapes (e.g. batch_norm nary=1 with short L): lane-dense path.
    if K < 128:
        y = _lane_dense_norm(x3, gamma, beta, eps=eps, budget=budget,
                             vmem_limit=vmem_limit)
        if y is not None:
            return y

    if affine:
        gamma3 = jnp.asarray(gamma, jnp.float32).reshape(1, G, 1)
        beta3 = jnp.asarray(beta, jnp.float32).reshape(1, G, 1)

    tg = _choose_tile_g(S, G, K, budget, ib)
    if tg is not None:
        # ---- Single-pass fused path, pipelined over G tiles. ----
        grid = (pl.cdiv(G, tg),)
        x_spec = pl.BlockSpec((S, tg, K), lambda g: (0, g, 0))
        p_spec = pl.BlockSpec((1, tg, 1), lambda g: (0, g, 0))
        params = pltpu.CompilerParams(dimension_semantics=("parallel",),
                                      vmem_limit_bytes=vmem_limit)
        if affine:
            return pl.pallas_call(
                functools.partial(_norm_affine_kernel, eps=eps),
                out_shape=jax.ShapeDtypeStruct((S, G, K), x3.dtype),
                grid=grid,
                in_specs=[x_spec, p_spec, p_spec],
                out_specs=x_spec,
                compiler_params=params,
            )(x3, gamma3, beta3)
        return pl.pallas_call(
            functools.partial(_norm_plain_kernel, eps=eps),
            out_shape=jax.ShapeDtypeStruct((S, G, K), x3.dtype),
            grid=grid,
            in_specs=[x_spec],
            out_specs=x_spec,
            compiler_params=params,
        )(x3)

    # ---- Two-pass fallback: a single group's (S, K) slab exceeds VMEM. ----
    gran = _sublane_granularity(ib)
    tg = gran if G >= gran else G
    # Stats kernel K tile (dtype-aware: double-buffered input + f32 temps).
    tk = max(128, _round_down_mult(budget // (S * tg * (2 * ib + 8)), 128))
    if tk >= K:
        tk = K
    grid = (pl.cdiv(G, tg), pl.cdiv(K, tk))
    x_spec = pl.BlockSpec((S, tg, tk), lambda g, k: (0, g, k))
    p_spec = pl.BlockSpec((1, tg, 1), lambda g, k: (0, g, 0))
    params = pltpu.CompilerParams(dimension_semantics=("parallel", "arbitrary"),
                                  vmem_limit_bytes=vmem_limit)
    stats_out = (jax.ShapeDtypeStruct((1, G, 1), jnp.float32),
                 jax.ShapeDtypeStruct((1, G, 1), jnp.float32))
    scratch = [pltpu.VMEM((1, tg, 1), jnp.float32),
               pltpu.VMEM((1, tg, 1), jnp.float32)]
    if affine:
        scale, shift = pl.pallas_call(
            functools.partial(_stats_affine_kernel, eps=eps, k_total=K),
            out_shape=stats_out,
            grid=grid,
            in_specs=[p_spec, p_spec, x_spec],
            out_specs=(p_spec, p_spec),
            scratch_shapes=scratch,
            compiler_params=params,
        )(gamma3, beta3, x3)
    else:
        scale, shift = pl.pallas_call(
            functools.partial(_stats_plain_kernel, eps=eps, k_total=K),
            out_shape=stats_out,
            grid=grid,
            in_specs=[x_spec],
            out_specs=(p_spec, p_spec),
            scratch_shapes=scratch,
            compiler_params=params,
        )(x3)

    # Apply kernel: every (g, k) block is independent -> both axes "parallel",
    # and its K tile is sized on its own (in + out double buffers + f32 temps).
    tka = max(128, _round_down_mult(budget // (S * tg * (4 * ib + 8)), 128))
    if tka >= K:
        tka = K
    grid_a = (pl.cdiv(G, tg), pl.cdiv(K, tka))
    xa_spec = pl.BlockSpec((S, tg, tka), lambda g, k: (0, g, k))
    pa_spec = pl.BlockSpec((1, tg, 1), lambda g, k: (0, g, 0))
    params_a = pltpu.CompilerParams(dimension_semantics=("parallel", "parallel"),
                                    vmem_limit_bytes=vmem_limit)
    return pl.pallas_call(
        _apply_kernel,
        out_shape=jax.ShapeDtypeStruct((S, G, K), x3.dtype),
        grid=grid_a,
        in_specs=[pa_spec, pa_spec, xa_spec],
        out_specs=xa_spec,
        compiler_params=params_a,
    )(scale, shift, x3)


class Normalization:
    """JAX/Pallas port of att_speech Normalization (forward pass only)."""

    def __init__(self, norm_type, nary, input_size, key=None):
        self.norm_type = norm_type if norm_type else "none"
        self.nary = nary
        self.input_size = input_size
        self.gamma = None
        self.beta = None
        if self.norm_type == "batch_norm":
            if nary not in (1, 2):
                raise ValueError("Unknown nary for batch_norm normalization")
            if key is None:
                key = jax.random.PRNGKey(0)
            kg, kb = jax.random.split(key)
            # Deterministic, non-trivial affine params standing in for
            # nn.BatchNorm{1,2}d(input_size).weight / .bias.
            self.gamma = jax.random.uniform(kg, (input_size,), jnp.float32, 0.5, 1.5)
            self.beta = 0.1 * jax.random.normal(kb, (input_size,), jnp.float32)
        elif self.norm_type == "instance_norm":
            if nary not in (1, 2):
                raise ValueError("Unknown nary for instance_norm normalization")
            # nn.InstanceNorm{1,2}d default: affine=False.
        elif self.norm_type == "none":
            pass
        else:
            raise ValueError("Unknown normalization type {}".format(norm_type))

    def __call__(self, x, speaker=None):
        if self.norm_type == "none":
            return x
        if self.norm_type == "batch_norm":
            if self.nary == 2:
                N, C, H, W = x.shape
                x3 = x.reshape(N, C, H * W)            # free reshape, no transpose
            else:
                x3 = x                                 # (N, C, L) is already (S, G, K)
            y3 = _group_norm(x3, self.gamma, self.beta)
            return y3.reshape(x.shape)
        # instance_norm: one group per (batch, channel) pair, no affine.
        if self.nary == 2:
            N, C, H, W = x.shape
            x3 = x.reshape(1, N * C, H * W)
        else:
            N, C, L = x.shape
            x3 = x.reshape(1, N * C, L)
        y3 = _group_norm(x3, None, None)
        return y3.reshape(x.shape)


# ---------------------------------------------------------------------------
# Pure-JAX references + tests
# ---------------------------------------------------------------------------
def _ref_norm(x, gamma, beta, per_instance, eps=_EPS):
    axes = tuple(range(2, x.ndim)) if per_instance else (0,) + tuple(range(2, x.ndim))
    mean = jnp.mean(x, axis=axes, keepdims=True)
    var = jnp.mean(jnp.square(x - mean), axis=axes, keepdims=True)
    y = (x - mean) * jax.lax.rsqrt(var + eps)
    if gamma is not None:
        pshape = (1, x.shape[1]) + (1,) * (x.ndim - 2)
        y = y * gamma.reshape(pshape) + beta.reshape(pshape)
    return y


def _ref_group_norm(x3, gamma, beta, eps=_EPS):
    mean = jnp.mean(x3, axis=(0, 2), keepdims=True)
    var = jnp.mean(jnp.square(x3 - mean), axis=(0, 2), keepdims=True)
    y = (x3 - mean) * jax.lax.rsqrt(var + eps)
    if gamma is not None:
        y = y * gamma.reshape(1, -1, 1) + beta.reshape(1, -1, 1)
    return y


if __name__ == "__main__":
    keys = jax.random.split(jax.random.PRNGKey(0), 10)
    k_x2, k_x1, k_p, k_big, k_fb, k_g, k_b, k_ld, k_lg, k_lb = keys

    def check(got, want, name, atol=2e-3, rtol=2e-3):
        got = jax.block_until_ready(got)
        assert got.shape == want.shape, name
        gotf = jnp.asarray(got, jnp.float32)
        assert bool(jnp.all(jnp.isfinite(gotf))), name
        assert bool(jnp.allclose(gotf, want, atol=atol, rtol=rtol)), name

    x_2d = jax.random.normal(k_x2, (2, 4, 16, 16), jnp.float32) * 2.0 + 0.5
    x_1d = jax.random.normal(k_x1, (2, 4, 16), jnp.float32) * 3.0 - 1.0

    bn2 = Normalization("batch_norm", 2, 4, key=k_p)
    check(bn2(x_2d), _ref_norm(x_2d, bn2.gamma, bn2.beta, per_instance=False),
          "batch_norm nary=2")

    bn1 = Normalization("batch_norm", 1, 4, key=k_p)
    check(bn1(x_1d), _ref_norm(x_1d, bn1.gamma, bn1.beta, per_instance=False),
          "batch_norm nary=1 (lane-dense)")

    in2 = Normalization("instance_norm", 2, 4)
    check(in2(x_2d), _ref_norm(x_2d, None, None, per_instance=True),
          "instance_norm nary=2")

    in1 = Normalization("instance_norm", 1, 4)
    check(in1(x_1d), _ref_norm(x_1d, None, None, per_instance=True),
          "instance_norm nary=1 (lane-dense)")

    ident = Normalization("none", 2, 4)
    assert bool(jnp.allclose(jax.block_until_ready(ident(x_2d)), x_2d))

    # bf16 input exercises the dtype-aware budgeting / packed-sublane path.
    x_bf = x_2d.astype(jnp.bfloat16)
    check(bn2(x_bf),
          _ref_norm(x_bf.astype(jnp.float32), bn2.gamma, bn2.beta, per_instance=False),
          "batch_norm nary=2 bf16", atol=5e-2, rtol=5e-2)

    # Tiled (multi-grid-step, pipelined) single-pass path via a forced budget.
    x_big = jax.random.normal(k_big, (1, 64, 512), jnp.float32) * 1.5 - 0.25
    check(_group_norm(x_big, None, None, vmem_budget=200_000),
          _ref_group_norm(x_big, None, None), "tiled single-pass path")

    # Two-pass (stats + apply) fallback, including the ragged last K tile.
    x_fb = jax.random.normal(k_fb, (1, 16, 1088), jnp.float32) * 0.7 + 3.0
    g_fb = jax.random.uniform(k_g, (16,), jnp.float32, 0.5, 1.5)
    b_fb = 0.1 * jax.random.normal(k_b, (16,), jnp.float32)
    check(_group_norm(x_fb, g_fb, b_fb, vmem_budget=100_000),
          _ref_group_norm(x_fb, g_fb, b_fb), "two-pass fallback path")

    # Lane-dense path with multiple grid steps and a ragged final G block.
    x_ld = jax.random.normal(k_ld, (2, 20, 16), jnp.float32) * 1.3 + 0.7
    g_ld = jax.random.uniform(k_lg, (20,), jnp.float32, 0.5, 1.5)
    b_ld = 0.1 * jax.random.normal(k_lb, (20,), jnp.float32)
    check(_group_norm(x_ld, g_ld, b_ld, vmem_budget=60_000),
          _ref_group_norm(x_ld, g_ld, b_ld), "lane-dense tiled + ragged path")

    print("KERNEL_OK")
</pallas_src>

<mosaic_0001>
module attributes {stable_mosaic.version = 11 : i64} {
  func.func @_norm_affine_kernel(%arg0: i32, %arg1: memref<2x4x256xf32, #tpu.memory_space<vmem>>, %arg2: memref<1x4x1xf32, #tpu.memory_space<vmem>>, %arg3: memref<1x4x1xf32, #tpu.memory_space<vmem>>, %arg4: memref<2x4x256xf32, #tpu.memory_space<vmem>>) attributes {dimension_semantics = [#tpu.dimension_semantics<parallel>], iteration_bounds = array<i64: 1>, scalar_prefetch = 0 : i64, scratch_operands = 0 : i64, tpu.core_type = #tpu.core_type<tc>, window_params = [{transform_indices = @transform_0, window_bounds = array<i64: 2, 4, 256>}, {transform_indices = @transform_1, window_bounds = array<i64: 1, 4, 1>}, {transform_indices = @transform_2, window_bounds = array<i64: 1, 4, 1>}, {transform_indices = @transform_3, window_bounds = array<i64: 2, 4, 256>}]} {
    %c0 = arith.constant 0 : index
    %c0_0 = arith.constant 0 : index
    %c0_1 = arith.constant 0 : index
    %0 = vector.load %arg2[%c0, %c0_0, %c0_1] : memref<1x4x1xf32, #tpu.memory_space<vmem>>, vector<1x4x1xf32>
    %c0_2 = arith.constant 0 : index
    %c0_3 = arith.constant 0 : index
    %c0_4 = arith.constant 0 : index
    %1 = vector.load %arg3[%c0_2, %c0_3, %c0_4] : memref<1x4x1xf32, #tpu.memory_space<vmem>>, vector<1x4x1xf32>
    %c0_5 = arith.constant 0 : index
    %c0_6 = arith.constant 0 : index
    %c0_7 = arith.constant 0 : index
    %2 = vector.load %arg1[%c0_5, %c0_6, %c0_7] : memref<2x4x256xf32, #tpu.memory_space<vmem>>, vector<2x4x256xf32>
    %cst = arith.constant dense<0.000000e+00> : vector<4x256xf32>
    %3 = vector.multi_reduction <add>, %2, %cst [0] : vector<2x4x256xf32> to vector<4x256xf32>
    %4 = vector.shape_cast %3 : vector<4x256xf32> to vector<1x4x256xf32>
    %cst_8 = arith.constant dense<0.000000e+00> : vector<1x4xf32>
    %5 = vector.multi_reduction <add>, %4, %cst_8 [2] : vector<1x4x256xf32> to vector<1x4xf32>
    %6 = vector.shape_cast %5 : vector<1x4xf32> to vector<1x4x1xf32>
    %cst_9 = arith.constant 5.120000e+02 : f32
    %7 = vector.broadcast %cst_9 : f32 to vector<1x4x1xf32>
    %8 = arith.divf %6, %7 : vector<1x4x1xf32>
    %9 = vector.broadcast %8 : vector<1x4x1xf32> to vector<2x4x256xf32>
    %10 = arith.subf %2, %9 : vector<2x4x256xf32>
    %11 = arith.mulf %10, %10 : vector<2x4x256xf32>
    %cst_10 = arith.constant dense<0.000000e+00> : vector<4x256xf32>
    %12 = vector.multi_reduction <add>, %11, %cst_10 [0] : vector<2x4x256xf32> to vector<4x256xf32>
    %13 = vector.shape_cast %12 : vector<4x256xf32> to vector<1x4x256xf32>
    %cst_11 = arith.constant dense<0.000000e+00> : vector<1x4xf32>
    %14 = vector.multi_reduction <add>, %13, %cst_11 [2] : vector<1x4x256xf32> to vector<1x4xf32>
    %15 = vector.shape_cast %14 : vector<1x4xf32> to vector<1x4x1xf32>
    %cst_12 = arith.constant 5.120000e+02 : f32
    %16 = vector.broadcast %cst_12 : f32 to vector<1x4x1xf32>
    %17 = arith.divf %15, %16 : vector<1x4x1xf32>
    %cst_13 = arith.constant 9.99999974E-6 : f32
    %18 = vector.broadcast %cst_13 : f32 to vector<1x4x1xf32>
    %19 = arith.addf %17, %18 : vector<1x4x1xf32>
    %20 = math.rsqrt %19 : vector<1x4x1xf32>
    %21 = arith.mulf %20, %0 : vector<1x4x1xf32>
    %22 = arith.mulf %8, %21 : vector<1x4x1xf32>
    %23 = arith.subf %1, %22 : vector<1x4x1xf32>
    %24 = vector.broadcast %21 : vector<1x4x1xf32> to vector<2x4x256xf32>
    %25 = arith.mulf %2, %24 : vector<2x4x256xf32>
    %26 = vector.broadcast %23 : vector<1x4x1xf32> to vector<2x4x256xf32>
    %27 = arith.addf %25, %26 : vector<2x4x256xf32>
    %c0_14 = arith.constant 0 : index
    %c0_15 = arith.constant 0 : index
    %c0_16 = arith.constant 0 : index
    %28 = vector.load %arg4[%c0_14, %c0_15, %c0_16] : memref<2x4x256xf32, #tpu.memory_space<vmem>>, vector<2x4x256xf32>
    tpu.vector_store %arg4[%c0_14, %c0_15, %c0_16], %27 {strides = array<i32>} : memref<2x4x256xf32, #tpu.memory_space<vmem>>, vector<2x4x256xf32>,
    return
  }
  func.func @transform_0(%arg0: i32) -> (i32, i32, i32) {
    %c0_i32 = arith.constant 0 : i32
    %c0_i32_0 = arith.constant 0 : i32
    %c0_i32_1 = arith.constant 0 : i32
    return %c0_i32, %arg0, %c0_i32_0 : i32, i32, i32
  }
  func.func @transform_1(%arg0: i32) -> (i32, i32, i32) {
    %c0_i32 = arith.constant 0 : i32
    %c0_i32_0 = arith.constant 0 : i32
    %c0_i32_1 = arith.constant 0 : i32
    return %c0_i32, %arg0, %c0_i32_0 : i32, i32, i32
  }
  func.func @transform_2(%arg0: i32) -> (i32, i32, i32) {
    %c0_i32 = arith.constant 0 : i32
    %c0_i32_0 = arith.constant 0 : i32
    %c0_i32_1 = arith.constant 0 : i32
    return %c0_i32, %arg0, %c0_i32_0 : i32, i32, i32
  }
  func.func @transform_3(%arg0: i32) -> (i32, i32, i32) {
    %c0_i32 = arith.constant 0 : i32
    %c0_i32_0 = arith.constant 0 : i32
    %c0_i32_1 = arith.constant 0 : i32
    return %c0_i32, %arg0, %c0_i32_0 : i32, i32, i32
  }
}

</mosaic_0001>

<bundles_post_ra>
// kernel: tpu_custom_call.1
= control target key start
LH: loop header
LB: loop body
LE: loop exit
PB: predicated region body
PF: predicated region fallthrough
CT: control target
= control target key end

     0   :  { %8 = vsyncpa [#allocation3], 0  ;;  %s369_s0 = inlined_call_operand.hbm [shape: f32[2,4,256], index: 0, kind: input, shape index: {}]   ;;  %s370_s1 = inlined_call_operand.hbm [shape: f32[1,4,1], index: 1, kind: input, shape index: {}]   ;;  %s371_s2 = inlined_call_operand.hbm [shape: f32[1,4,1], index: 2, kind: input, shape index: {}]   ;;  %s372_s3 = inlined_call_operand.hbm [shape: f32[2,4,256], index: 3, kind: output, shape index: {}]  }
   0x1   :  { %9 = vsyncpa [#allocation6], 0 }
   0x2   :  { %10 = vsyncpa [#allocation4], 0  ;;  %s268_s12 = smov [#allocation5]   ;;  %s269_s14 = smov [#allocation2]  }
   0x3   :  { %s29_s13 = sshll.u32 %s268_s12, 4  ;;  %s16_s15 = sshll.u32 %s269_s14, 4  ;;  %s30_s13 = int_to_ptr.vmem [resolvable:$true] %s29_s13  ;;  %s296_s15 = int_to_ptr.vmem [resolvable:$true] %s16_s15 }
   0x4   :  { %s174_s18 = scalar_lea.hbm %s370_s1, 64 }
   0x5   :  { %p175_p0 = scmp.ne.s32.totalorder %s370_s1, %s174_s18  ;;  %p178_p1 = scmp.lt.u32.totalorder %s174_s18, %s370_s1 }
   0x7   :  { %p180_p2 = pnand %p178_p1, %p175_p0 }
   0x9   :  { %183 = shalt.err (!%p180_p2)
}
   0xa   :  { %s184_s23 = scalar_lea.vmem %s30_s13, 64  ;;  %p189_p4 = scmp.lt.s32.totalorder %s30_s13, %s30_s13 }
   0xb   :  { %p185_p3 = scmp.ne.s32.totalorder %s30_s13, %s184_s23  ;;  %p190_p5 = scmp.lt.s32.totalorder %s184_s23, %s184_s23 }
   0xd   :  { %p191_p6 = por %p190_p5, %p189_p4 }
   0xf   :  { %p192_p7 = pnand %p191_p6, %p185_p3 }
  0x11   :  { %195 = shalt.err (!%p192_p7)
}
  0x12   :  { %32 = dma.hbm_to_vmem [thread:$0]  %s370_s1, 64, %s30_s13, [#allocation6]  }
  0x13   :  { %s196_s28 = scalar_lea.hbm %s369_s0, 256 }
  0x14   :  { %p197_p8 = scmp.ne.s32.totalorder %s369_s0, %s196_s28  ;;  %p200_p9 = scmp.lt.u32.totalorder %s196_s28, %s369_s0 }
  0x16   :  { %p202_p10 = pnand %p200_p9, %p197_p8 }
  0x18   :  { %205 = shalt.err (!%p202_p10)
}
  0x19   :  { %s206_s6 = scalar_lea.vmem %s296_s15, 256  ;;  %p211_p12 = scmp.lt.s32.totalorder %s296_s15, %s296_s15 }
  0x1a   :  { %p207_p11 = scmp.ne.s32.totalorder %s296_s15, %s206_s6  ;;  %p212_p13 = scmp.lt.s32.totalorder %s206_s6, %s206_s6 }
  0x1c   :  { %p213_p0 = por %p212_p13, %p211_p12 }
  0x1e   :  { %p214_p1 = pnand %p213_p0, %p207_p11 }
  0x20   :  { %217 = shalt.err (!%p214_p1)
}
  0x21   :  { %s270_s1 = smov 128   ;;  %s271_s7 = smov 8  }
  0x22   :  { %22 = dma.hbm_to_vmem [thread:$0]  %s369_s0, 256, %s296_s15, [#allocation3], %s270_s1, %s270_s1, %s271_s7  }
  0x23   :  { %s272_s10 = smov [#allocation7]   ;;  %s218_s14 = scalar_lea.hbm %s371_s2, 64 }
  0x24   :  { %s39_s11 = sshll.u32 %s272_s10, 4  ;;  %p219_p2 = scmp.ne.s32.totalorder %s371_s2, %s218_s14  ;;  %s40_s11 = int_to_ptr.vmem [resolvable:$true] %s39_s11 }
  0x25   :  { %p222_p3 = scmp.lt.u32.totalorder %s218_s14, %s371_s2 }
  0x27   :  { %p224_p4 = pnand %p222_p3, %p219_p2 }
  0x29   :  { %227 = shalt.err (!%p224_p4)
}
  0x2a   :  { %s228_s20 = scalar_lea.vmem %s40_s11, 64  ;;  %p233_p6 = scmp.lt.s32.totalorder %s40_s11, %s40_s11 }
  0x2b   :  { %p229_p5 = scmp.ne.s32.totalorder %s40_s11, %s228_s20  ;;  %p234_p7 = scmp.lt.s32.totalorder %s228_s20, %s228_s20 }
  0x2d   :  { %p235_p8 = por %p234_p7, %p233_p6 }
  0x2f   :  { %p236_p9 = pnand %p235_p8, %p229_p5 }
  0x31   :  { %239 = shalt.err (!%p236_p9)
}
  0x32   :  { %42 = dma.hbm_to_vmem [thread:$0]  %s371_s2, 64, %s40_s11, [#allocation6]  }
  0x33   :  { %262 = dma.done.wait [#allocation3], 256  }
  0x34   :  { %263 = vsyncadd [#allocation3], 4294967040 }
  0x35   :  { %264 = dma.done.wait [#allocation6], 128  }
  0x36   :  { %265 = vsyncadd [#allocation6], 4294967168  ;;  %vm62_vm0 = vcmask 1043456   ;;  %v54_v0 = vld [vmem:[#allocation2] sm:$0xff]  ;;  %v55_v1 = vld [vmem:[#allocation2 + $0x8] sm:$0xff]  ;;  %v80_v15 = vlaneseq  ;;  %v274_v37 = vmov 0  }
  0x37   :  { %v58_v2 = vcombine.high %v54_v0, %v54_v0  ;;  %v59_v3 = vcombine.high %v55_v1, %v55_v1  ;;  %v63_v4 = vsel %vm62_vm0, %v54_v0, 0.0  ;;  %v64_v5 = vsel %vm62_vm0, %v55_v1, 0.0  ;;  %168 = vset.pattern.permute.xlu1 %v274_v37  ;;  %169 = vset.pattern.permute.xlu0 %v274_v37  ;;  %v52_v41 = vld [vmem:[#allocation5] sm:$0xf]  ;;  %v53_v44 = vld [vmem:[#allocation7] sm:$0xf] }
  0x38   :  { %v65_v6 = vadd.f32 %v64_v5, %v63_v4  ;;  %v273_v13 = vmov 839922192   ;;  %v81_v17 = vshrl.u32 %v80_v15, 7  ;;  %s275_s2 = smov [#allocation8]  }
  0x39   :  { %v66_v7 = vsel %vm62_vm0, %v58_v2, 0.0  ;;  %v67_v8 = vsel %vm62_vm0, %v59_v3, 0.0  ;;  %v78_v14 = vunpack.c.l.s4 %v273_v13  ;;  %s147_s21 = sshll.u32 %s275_s2, 4  ;;  %s148_s21 = int_to_ptr.vmem [resolvable:$true] %s147_s21 }
  0x3a   :  { %v68_v9 = vadd.f32 %v67_v8, %v66_v7  ;;  %v69_v10 = vsel %vm62_vm0, %v65_v6, 0.0  ;;  %s240_s22 = scalar_lea.vmem %s148_s21, 256  ;;  %p245_p11 = scmp.lt.s32.totalorder %s148_s21, %s148_s21 }
  0x3b   :  { %v79_v16 = vunpack.c.0.s8 %v78_v14  ;;  %p241_p10 = scmp.ne.s32.totalorder %s148_s21, %s240_s22  ;;  %p246_p12 = scmp.lt.s32.totalorder %s240_s22, %s240_s22 }
  0x3c   :  { %v70_v11 = vsel %vm62_vm0, %v68_v9, 0.0 }
  0x3d   :  { %v71_v12 = vadd.f32 %v70_v11, %v69_v10  ;;  %v82_v18 = vsub.s32 %v79_v16, %v81_v17  ;;  %p247_p13 = por %p246_p12, %p245_p11 }
  0x3f   :  { %72 = vadd.xlane.f32.xlu0 %v71_v12  ;;  %p248_p0 = pnand %p247_p13, %p241_p10 }
  0xcc   :  { %v73_v19 = vpop.xlane.xlu0 %72 }
  0xcd   :  { %v75_v20 = vmul.f32 0.001953125, %v73_v19 }
  0xcf   :  { %v83_v21 = vrot.slane %v75_v20, %v82_v18 }
  0xd1   :  { %v85_v22 = vsub.f32 %v54_v0, %v83_v21  ;;  %v86_v23 = vsub.f32 %v55_v1, %v83_v21 }
  0xd3   :  { %v87_v24 = vmul.f32 %v85_v22, %v85_v22  ;;  %v88_v25 = vmul.f32 %v86_v23, %v86_v23 }
  0xd5   :  { %v91_v26 = vcombine.high %v87_v24, %v87_v24  ;;  %v92_v27 = vcombine.high %v88_v25, %v88_v25  ;;  %v95_v28 = vsel %vm62_vm0, %v87_v24, 0.0  ;;  %v96_v29 = vsel %vm62_vm0, %v88_v25, 0.0 }
  0xd6   :  { %v97_v30 = vadd.f32 %v96_v29, %v95_v28 }
  0xd7   :  { %v98_v31 = vsel %vm62_vm0, %v91_v26, 0.0  ;;  %v99_v32 = vsel %vm62_vm0, %v92_v27, 0.0 }
  0xd8   :  { %v100_v33 = vadd.f32 %v99_v32, %v98_v31  ;;  %v101_v34 = vsel %vm62_vm0, %v97_v30, 0.0 }
  0xda   :  { %v102_v35 = vsel %vm62_vm0, %v100_v33, 0.0 }
  0xdb   :  { %v103_v36 = vadd.f32 %v102_v35, %v101_v34 }
  0xdd   :  { %104 = vadd.xlane.f32.xlu0 %v103_v36 }
 0x16a   :  { %v105_v38 = vpop.xlane.xlu0 %104 }
 0x16b   :  { %v106_v39 = vmul.f32 0.001953125, %v105_v38 }
 0x16d   :  { %v107_v40 = vadd.f32 1e-05, %v106_v39 }
 0x16f   :  { %172 = vrsqrt.f32 %v107_v40 }
 0x179   :  { %v173_v42 = vpop.eup %172 }
 0x17a   :  { %v109_v43 = vmul.f32 %v173_v42, %v52_v41 }
 0x17c   :  { %114 = vperm.xlu1 %168, %v109_v43   ;;  %v110_v45 = vmul.f32 %v109_v43, %v75_v20 }
 0x17e   :  { %v111_v46 = vsub.f32 %v53_v44, %v110_v45 }
 0x180   :  { %128 = vperm.xlu1 %168, %v111_v46  }
 0x1fb   :  { %v115_v47 = vpop.permute.xlu1 %114 }
 0x1fc   :  { %v122_v48 = vrot.slane %v115_v47, %v82_v18 }
 0x1fe   :  { %v124_v50 = vmul.f32 %v122_v48, %v54_v0  ;;  %v125_v51 = vmul.f32 %v122_v48, %v55_v1 }
 0x1ff   :  { %v129_v49 = vpop.permute.xlu1 %128 }
 0x200   :  { %v136_v52 = vrot.slane %v129_v49, %v82_v18 }
 0x202   :  { %v138_v53 = vadd.f32 %v136_v52, %v124_v50  ;;  %v139_v54 = vadd.f32 %v136_v52, %v125_v51 }
 0x204   :  { %140 = vst [vmem:[#allocation8] sm:$0xff] %v138_v53  ;;  %141 = vst [vmem:[#allocation8 + $0x8] sm:$0xff] %v139_v54 }
 0x205   :  { %251 = shalt.err (!%p248_p0)
}
 0x206   :  { %s252_s25 = scalar_lea.hbm %s372_s3, 256 }
 0x207   :  { %p253_p1 = scmp.ne.s32.totalorder %s372_s3, %s252_s25  ;;  %p256_p2 = scmp.lt.u32.totalorder %s252_s25, %s372_s3 }
 0x209   :  { %p258_p3 = pnand %p256_p2, %p253_p1 }
 0x20b   :  { %261 = shalt.err (!%p258_p3)
}
 0x20c   :  { %153 = dma.vmem_to_hbm [thread:$0]  %s148_s21, 256, %s372_s3, [#allocation4], %s270_s1, %s270_s1, %s271_s7  }
 0x20d   :  { %266 = dma.done.wait [#allocation4], 256  }
 0x20e   :  { %267 = vsyncadd [#allocation4], 4294967040 }
 0x20f   :  { %157 = vsyncpa [#allocation3], 1 }
 0x210   :  { %158 = vsyncpa [#allocation6], 1 }
 0x211   :  { %159 = vsyncpa [#allocation4], 1 }

</bundles_post_ra>
